<compile_context>
chip_gen: v7x
topology: tpu7x:2x2x1
jax: 0.10.0
libtpu: 0.0.40
codegen_flags: <defaults>
</compile_context>

<pallas_src>
import math

import jax
import jax.numpy as jnp
from jax.experimental import pallas as pl
from jax.experimental.pallas import tpu as pltpu

_V7X_SAFE_VMEM = 48 * 1024 * 1024  # scoped-VMEM cap that is safe on v5e / v6e / v7x


def _pe_add_kernel(x_ref, pe_ref, o_ref):
    # x_ref / o_ref: (TILE_B, TILE_D, TILE_L); pe_ref: (TILE_D, TILE_L).
    # Broadcast the positional-encoding tile over the batch dim in-register (VPU);
    # the add is pure filler under the DMA bottleneck.
    o_ref[...] = x_ref[...] + pe_ref[...][None, :, :]


def make_pe_table(d_model: int, max_len: int, dtype=jnp.float32) -> jnp.ndarray:
    """Deterministic positional-encoding buffer, same math as the PyTorch __init__.

    Returns a 2-D (d_model, max_len) table (the PyTorch buffer is the same data with
    a leading size-1 dim).  Build it once in the model dtype so the forward never
    pays a per-call conversion pass.  Handles odd d_model by slicing the cos branch.
    """
    position = jnp.arange(0, max_len, dtype=jnp.float32)[:, None]            # (max_len, 1)
    div_term = jnp.exp(
        jnp.arange(0, d_model, 2, dtype=jnp.float32) * (-math.log(10000.0) / d_model)
    )                                                                         # (ceil(d/2),)
    arg = position * div_term                                                 # (max_len, ceil(d/2))
    pe = jnp.zeros((max_len, d_model), dtype=jnp.float32)
    pe = pe.at[:, 0::2].set(jnp.sin(arg))
    pe = pe.at[:, 1::2].set(jnp.cos(arg)[:, : d_model // 2])                  # odd-d_model safe
    # PyTorch: unsqueeze(0).transpose(2, 1) -> (1, d_model, max_len); keep it 2-D here.
    return pe.T.astype(dtype)                                                 # (d_model, max_len)


def _largest_aligned_divisor(n: int, align: int, cap: int):
    """Largest d <= cap with d % align == 0 and n % d == 0; None if n % align != 0."""
    if n % align != 0:
        return None
    best = None
    d = align
    limit = min(n, cap)
    while d <= limit:
        if n % d == 0:
            best = d
        d += align
    return best


def _largest_divisor_leq(n: int, cap: int) -> int:
    """Largest divisor of n that is <= cap (>= 1)."""
    for d in range(max(1, min(n, cap)), 0, -1):
        if n % d == 0:
            return d
    return 1


def positional_encoding(x: jnp.ndarray,
                        pe: jnp.ndarray,
                        *,
                        block_budget_bytes: int = 8 * 1024 * 1024,
                        small_fallback_bytes: int = 2 * 1024 * 1024,
                        donate_x: bool = False) -> jnp.ndarray:
    """x: (B, d_model, max_len); pe: (d_model, max_len) or (1, d_model, max_len).

    Returns x + pe broadcast over batch (the PyTorch forward; dropout is never called
    there, so it is intentionally a no-op).  Sequences shorter than the table's
    max_len require the caller to slice pe first (same constraint as the PyTorch
    broadcast).
    """
    assert x.ndim == 3, "expected x of shape (B, d_model, max_len)"
    B, d_model, max_len = x.shape
    if pe.ndim == 3:                      # accept the original (1, d_model, max_len) buffer
        pe = pe[0]
    assert pe.shape == (d_model, max_len)
    if pe.dtype != x.dtype:
        # No-op when the table was built with make_pe_table(dtype=x.dtype) (recommended).
        pe = pe.astype(x.dtype)

    itemsize = jnp.dtype(x.dtype).itemsize

    # ---- Fast path: tiny tensors and ragged lane widths. --------------------------
    # * Tiny tensors (incl. the module default (2, 32, 10)): the standalone
    #   pallas_call's fixed cost (grid setup, DMA descriptors, pipeline prologue /
    #   epilogue) dwarfs the add; let XLA fuse it into a neighboring op instead.
    # * max_len % 128 != 0: a sub-128 output lane width forces masked vst.msk partial
    #   stores -- the plain XLA add is cheaper than entering the kernel for these.
    if (x.size * itemsize < small_fallback_bytes) or (max_len % 128 != 0):
        return x + pe[None, :, :]

    # ---- Tiling heuristic (pure HBM-stream, pick big lane-dense blocks). ----------
    # Minimum sublane granularity by dtype packing (f32: 8, bf16: 16, int8/fp8: 32).
    sublane = {4: 8, 2: 16, 1: 32}.get(itemsize, 8)

    # v7x has only 64 MiB physical VMEM per TC: cap the x-block budget so the
    # worst-case double-buffered footprint 2*(x + out + pe) <= ~42 MiB, leaving
    # headroom under the 48 MiB scoped limit.  (On v5e/v6e with 128 MiB VMEM this
    # clamp could be raised, but the extra win is only a few %.)
    block_budget_bytes = max(1, min(block_budget_bytes,
                                    (_V7X_SAFE_VMEM - 6 * 1024 * 1024) // 6))
    budget_elems = max(1, block_budget_bytes // itemsize)

    # Batch-per-block: keep the whole batch in the block if it fits with a
    # (sublane, ~512)-lane minimum tile; otherwise shrink the batch-per-block rather
    # than dropping the lane tile below ~512 (keeps DMAs lane-dense for large B).
    pref_l = _largest_aligned_divisor(max_len, 128, 512) or 128
    tile_b = _largest_divisor_leq(B, max(1, budget_elems // (sublane * pref_l)))

    # Lane (last) axis: no hard cap beyond the budget -- cover as much of max_len
    # as possible (measured streaming adds hit ~85-86% of HBM roofline at >=512).
    lane_cap = max(128, budget_elems // max(1, tile_b * sublane))
    tile_l = _largest_aligned_divisor(max_len, 128, lane_cap) or 128

    # Sublane (d_model) axis: fill the remaining per-block budget.  Full extent is
    # legal (and used) when d_model is not a multiple of the sublane granularity.
    d_cap = max(sublane, budget_elems // max(1, tile_b * tile_l))
    tile_d = _largest_aligned_divisor(d_model, sublane, d_cap) or d_model

    d_blocks = d_model // tile_d
    l_blocks = max_len // tile_l
    b_blocks = B // tile_b

    # v7x has 2 TensorCores per chip and the grid axes are all "parallel": a 1-step
    # grid leaves one TC idle and halves the achievable stream bandwidth.  Guarantee
    # >= 2 steps by splitting the lane axis first, then d_model, then batch.
    while d_blocks * l_blocks * b_blocks < 2:
        new_l = (_largest_aligned_divisor(max_len, 128, tile_l // 2)
                 if tile_l >= 256 else None)
        if new_l is not None:
            tile_l = new_l
            l_blocks = max_len // tile_l
            continue
        new_d = (_largest_aligned_divisor(d_model, sublane, tile_d // 2)
                 if tile_d >= 2 * sublane else None)
        if new_d is not None:
            tile_d = new_d
            d_blocks = d_model // tile_d
            continue
        if tile_b > 1:
            tile_b = _largest_divisor_leq(B, tile_b // 2)
            b_blocks = B // tile_b
            continue
        break  # already at the (sublane, 128) minimum block; nothing left to split

    grid = (d_blocks, l_blocks, b_blocks)

    # Scoped-VMEM limit from the actual double-buffered footprint, capped at 48 MiB
    # (safe on all of v5e / v6e / v7x).
    x_block_bytes = tile_b * tile_d * tile_l * itemsize
    pe_block_bytes = tile_d * tile_l * itemsize
    footprint = 2 * (2 * x_block_bytes + pe_block_bytes)     # x, out, pe double-buffered
    vmem_limit = min(_V7X_SAFE_VMEM, max(footprint * 5 // 4, 8 * 1024 * 1024))

    return pl.pallas_call(
        _pe_add_kernel,
        out_shape=jax.ShapeDtypeStruct((B, d_model, max_len), x.dtype),
        grid_spec=pltpu.PrefetchScalarGridSpec(
            num_scalar_prefetch=0,
            grid=grid,
            in_specs=[
                # x: batch block on the innermost grid axis; last two block dims are
                # multiples of (sublane, 128) or full extents (tiling constraint).
                pl.BlockSpec((tile_b, tile_d, tile_l), lambda i, j, b: (b, i, j)),
                # pe: block index never depends on the innermost batch axis, so the
                # pipeline elides re-fetches -> pe HBM traffic stays O(d_model*max_len).
                pl.BlockSpec((tile_d, tile_l), lambda i, j, b: (i, j)),
            ],
            out_specs=pl.BlockSpec((tile_b, tile_d, tile_l), lambda i, j, b: (b, i, j)),
        ),
        compiler_params=pltpu.CompilerParams(
            # No reduction axis: every grid axis is parallel (v7x megacore sharding).
            dimension_semantics=("parallel", "parallel", "parallel"),
            vmem_limit_bytes=vmem_limit,
        ),
        # Elementwise and in-place-safe per block: alias x -> out when the caller
        # donates x (halves peak HBM footprint; no bandwidth change).
        input_output_aliases=({0: 0} if donate_x else {}),
    )(x, pe)


if __name__ == "__main__":
    key = jax.random.PRNGKey(0)

    # --- Check 1: the module's default shapes (batch=2, d_model=32, max_len=10).
    #     Tiny + ragged lane width -> takes the XLA fast path (cheapest & correct).
    d_model, max_len, batch = 32, 10, 2
    x = jax.random.normal(key, (batch, d_model, max_len), dtype=jnp.float32)
    pe = make_pe_table(d_model, max_len, dtype=jnp.float32)
    out = jax.block_until_ready(positional_encoding(x, pe))
    ref = x + pe[None, :, :]
    assert out.shape == x.shape
    assert jnp.allclose(out, ref, atol=1e-6, rtol=1e-6), "mismatch vs reference (default shape)"

    # --- Check 2: run the Pallas kernel on a lane-dense shape; small_fallback_bytes=0
    #     bypasses the small-tensor fast path, and the >=2-step guarantee splits the
    #     lane axis so the grid becomes (1, 2, 1) even though one block would fit.
    d2, l2, b2 = 64, 256, 2
    x2 = jax.random.normal(jax.random.fold_in(key, 1), (b2, d2, l2), dtype=jnp.float32)
    pe2 = make_pe_table(d2, l2, dtype=jnp.float32)
    out2 = jax.block_until_ready(positional_encoding(x2, pe2, small_fallback_bytes=0))
    ref2 = x2 + pe2[None, :, :]
    assert jnp.allclose(out2, ref2, atol=1e-6, rtol=1e-6), "mismatch vs reference (kernel, 2-step)"

    # --- Check 3: a deliberately tiny block budget exercises multi-block d_model
    #     tiling, the batch/lane/sublane caps, and the pe index_map (grid = (8, 1, 1)).
    d3, l3, b3 = 64, 512, 4
    x3 = jax.random.normal(jax.random.fold_in(key, 2), (b3, d3, l3), dtype=jnp.float32)
    pe3 = make_pe_table(d3, l3, dtype=jnp.float32)
    out3 = jax.block_until_ready(
        positional_encoding(x3, pe3, block_budget_bytes=64 * 1024, small_fallback_bytes=0))
    ref3 = x3 + pe3[None, :, :]
    assert jnp.allclose(out3, ref3, atol=1e-6, rtol=1e-6), "mismatch vs reference (kernel, tiled)"

    print("KERNEL_OK")
</pallas_src>

<mosaic_0001>
module attributes {stable_mosaic.version = 11 : i64} {
  func.func @_pe_add_kernel(%arg0: i32, %arg1: i32, %arg2: i32, %arg3: memref<2x64x128xf32, #tpu.memory_space<vmem>>, %arg4: memref<64x128xf32, #tpu.memory_space<vmem>>, %arg5: memref<2x64x128xf32, #tpu.memory_space<vmem>>) attributes {dimension_semantics = [#tpu.dimension_semantics<parallel>, #tpu.dimension_semantics<parallel>, #tpu.dimension_semantics<parallel>], iteration_bounds = array<i64: 1, 2, 1>, scalar_prefetch = 0 : i64, scratch_operands = 0 : i64, tpu.core_type = #tpu.core_type<tc>, window_params = [{transform_indices = @transform_0, window_bounds = array<i64: 2, 64, 128>}, {transform_indices = @transform_1, window_bounds = array<i64: 64, 128>}, {transform_indices = @transform_2, window_bounds = array<i64: 2, 64, 128>}]} {
    %c0 = arith.constant 0 : index
    %c0_0 = arith.constant 0 : index
    %c0_1 = arith.constant 0 : index
    %0 = vector.load %arg3[%c0, %c0_0, %c0_1] : memref<2x64x128xf32, #tpu.memory_space<vmem>>, vector<2x64x128xf32>
    %c0_2 = arith.constant 0 : index
    %c0_3 = arith.constant 0 : index
    %1 = vector.load %arg4[%c0_2, %c0_3] : memref<64x128xf32, #tpu.memory_space<vmem>>, vector<64x128xf32>
    %2 = vector.shape_cast %1 : vector<64x128xf32> to vector<1x64x128xf32>
    %3 = vector.broadcast %2 : vector<1x64x128xf32> to vector<2x64x128xf32>
    %4 = arith.addf %0, %3 : vector<2x64x128xf32>
    %c0_4 = arith.constant 0 : index
    %c0_5 = arith.constant 0 : index
    %c0_6 = arith.constant 0 : index
    %5 = vector.load %arg5[%c0_4, %c0_5, %c0_6] : memref<2x64x128xf32, #tpu.memory_space<vmem>>, vector<2x64x128xf32>
    tpu.vector_store %arg5[%c0_4, %c0_5, %c0_6], %4 {strides = array<i32>} : memref<2x64x128xf32, #tpu.memory_space<vmem>>, vector<2x64x128xf32>,
    return
  }
  func.func @transform_0(%arg0: i32, %arg1: i32, %arg2: i32) -> (i32, i32, i32) {
    %c0_i32 = arith.constant 0 : i32
    return %arg2, %arg0, %arg1 : i32, i32, i32
  }
  func.func @transform_1(%arg0: i32, %arg1: i32, %arg2: i32) -> (i32, i32) {
    %c0_i32 = arith.constant 0 : i32
    return %arg0, %arg1 : i32, i32
  }
  func.func @transform_2(%arg0: i32, %arg1: i32, %arg2: i32) -> (i32, i32, i32) {
    %c0_i32 = arith.constant 0 : i32
    return %arg2, %arg0, %arg1 : i32, i32, i32
  }
}

</mosaic_0001>

<bundles_post_ra>
// kernel: tpu_custom_call.1
= control target key start
LH: loop header
LB: loop body
LE: loop exit
PB: predicated region body
PF: predicated region fallthrough
CT: control target
= control target key end

     0   :  { %7 = vsyncpa [#allocation3], 0  ;;  %s975_s0 = inlined_call_operand.hbm [shape: f32[2,64,256], index: 0, kind: input, shape index: {}]   ;;  %s976_s1 = inlined_call_operand.hbm [shape: f32[64,256], index: 1, kind: input, shape index: {}]   ;;  %s977_s2 = inlined_call_operand.hbm [shape: f32[2,64,256], index: 2, kind: output, shape index: {}]  }
   0x1   :  { %9 = vsyncpa [#allocation3 + $0x1], 0 }
   0x2   :  { %10 = vsyncpa [#allocation6], 0 }
   0x3   :  { %12 = vsyncpa [#allocation6 + $0x1], 0 }
   0x4   :  { %13 = vsyncpa [#allocation4], 0 }
   0x5   :  { %15 = vsyncpa [#allocation4 + $0x1], 0  ;;  %s696_s9 = smov 0   ;;  %s698_s10 = smov 0  }
   0x6   :  { %s700_s11 = smov 0   ;;  %s702_s12 = smov 0  }
   0x7   :  { %s704_s13 = smov 0   ;;  %s706_s14 = smov 0  }
   0x8 LB: > { %s435_s15 = sadd.s32 4294967295, %s670_s14   ;;  %s436_s16 = sadd.s32 4294967294, %s670_s14   ;;  %s670_s14 = sphi %s706_s14, %s21_s14   ;;  %s666_s13 = sphi %s704_s13, %s994_s13   ;;  %s662_s12 = sphi %s702_s12, %s993_s12   ;;  %s658_s11 = sphi %s700_s11, %s992_s11   ;;  %s654_s10 = sphi %s698_s10, %s991_s10   ;;  %s650_s9 = sphi %s696_s9, %s990_s9  }
   0x9   : > { %s36_s17 = sadd.s32 1, %s666_s13  ;;  %s51_s18 = sadd.s32 1, %s658_s11 }
   0xa   : > { %p38_p0 = scmp.ge.s32.totalorder %s36_s17, 2  ;;  %p58_p1 = scmp.ne.s32.totalorder %s658_s11, %s654_s10 }
   0xb   : > { %p59_p2 = scmp.eq.s32.totalorder %s670_s14, 0  ;;  %p64_p3 = scmp.ne.s32.totalorder %s654_s10, %s650_s9 }
   0xc   : > { %s996_s17 = smov (%p38_p0, %s36_s17), 0  ;;  %p65_p5 = scmp.eq.s32.totalorder %s435_s15, 0 }
   0xd   : > { %p737_p4 = por %p59_p2, %p58_p1  ;;  %s47_s20 = ssub.s32 %s666_s13, %s996_s17 }
   0xe   : > { %p120_p6 = scmp.eq.s32.totalorder %s435_s15, 1  ;;  %p49_p7 = scmp.eq.s32.totalorder %s47_s20, 0 }
   0xf   : > { %p743_p8 = por %p65_p5, %p64_p3  ;;  %p126_p10 = scmp.eq.s32.totalorder %s436_s16, 1 }
  0x10   : > { %p747_p9 = por %p120_p6, %p58_p1  ;;  %p468_p13 = scmp.lt.s32.totalorder %s670_s14, 2 }
  0x11   : > { %s981_s21 = scalar_select %p743_p8, 1, 0 }
  0x12   : > { %s982_s22 = scalar_select %p747_p9, 1, 0 }
  0x13   : > { %s752_s23 = scalar_select %p49_p7, %s658_s11, %s51_s18  }
  0x14   : > { %p754_p11 = por %p126_p10, %p64_p3  ;;  %s761_s25 = sand.u32 1, %s658_s11  }
  0x15   : > { %s439_s26 = sshll.u32 %s761_s25, 7  ;;  %s440_s27 = sshll.u32 %s666_s13, 7 }
  0x16   : > { %s983_s24 = scalar_select %p754_p11, 1, 0 }
  0x17   : > { %s770_s30 = scalar_lea.hbm %s975_s0, %s440_s27  ;;  %s150_s3 = scalar_lea.vmem [#allocation2], %s439_s26 }
  0x18   : > { %s162_s4 = sshll.u32 %s150_s3, 4  ;;  %p776_p0 = pnand %p468_p13, %p737_p4  ;;  %s772_s4 = int_to_ptr.vmem [resolvable:$true] %s162_s4 }
  0x19   : > { %s147_s6 = scalar_lea.sflag [#allocation3], %s761_s25  ;;  %s524_s7 = scalar_lea.hbm %s770_s30, 2048 }
  0x1a   : > { %p525_p1 = scmp.ne.s32.totalorder %s770_s30, %s524_s7  ;;  %p526_p2 = pneg %p776_p0 }
  0x1b   : > { %s529_s16 = scalar_lea.hbm %s975_s0, 4096  ;;  %p530_p4 = scmp.lt.u32.totalorder %s770_s30, %s975_s0 }
  0x1c   : > { %p527_p3 = pnand %p526_p2, %p525_p1  ;;  %p531_p6 = scmp.lt.u32.totalorder %s529_s16, %s524_s7 }
  0x1d   : > { %p533_p10 = scmp.lt.u32.totalorder %s524_s7, %s770_s30 }
  0x1e   : > { %p528_p5 = pneg %p527_p3  ;;  %p532_p7 = por %p531_p6, %p530_p4 }
  0x20   : > { %p534_p13 = por %p533_p10, %p532_p7 }
  0x22   : > { %p535_p12 = pnand %p534_p13, %p528_p5 }
  0x24   : > { %538 = shalt.err (!%p535_p12)
}
  0x25   : > { %s539_s20 = scalar_lea.vmem %s772_s4, 2048  ;;  %s672_s26 = smov [#allocation2]  }
  0x26   : > { %p540_p1 = scmp.ne.s32.totalorder %s772_s4, %s539_s20  ;;  %s544_s28 = sshll.u32 %s672_s26, 4  ;;  %s545_s28 = int_to_ptr.vmem [resolvable:$false] %s544_s28 }
  0x27   : > { %s546_s29 = scalar_lea.vmem %s545_s28, 4096  ;;  %p547_p9 = scmp.lt.s32.totalorder %s772_s4, %s545_s28 }
  0x28   : > { %p542_p3 = pnand %p540_p1, %p526_p2  ;;  %p548_p4 = scmp.lt.s32.totalorder %s546_s29, %s539_s20 }
  0x2a   : > { %p543_p11 = pneg %p542_p3  ;;  %p549_p6 = por %p548_p4, %p547_p9 }
  0x2c   : > { %p550_p7 = pnand %p549_p6, %p543_p11 }
  0x2e   : > { %553 = shalt.err (!%p550_p7)
}
  0x2f   : > { %s673_s3 = smov 256   ;;  %s674_s7 = smov 128  }
  0x30   : > { %s675_s8 = smov 8   ;;  %p443_p9 = scmp.ge.s32.totalorder %s670_s14, 1 }
  0x31   : > { %460 = dma.hbm_to_vmem [thread:$0]  (!%p776_p0), %s770_s30, 2048, %s772_s4, %s147_s6, %s673_s3, %s674_s7, %s675_s8  }
  0x32   : > { %p193_p11 = scmp.lt.s32.totalorder %s670_s14, 3  ;;  %s441_s15 = sshll.u32 %s761_s25, 6 }
  0x33   : > { %s823_s20 = scalar_lea.hbm %s976_s1, %s440_s27  ;;  %s176_s26 = scalar_lea.vmem [#allocation5], %s441_s15 }
  0x34   : > { %p814_p12 = pnand %p443_p9, %p193_p11  ;;  %s185_s28 = sshll.u32 %s176_s26, 4  ;;  %s825_s28 = int_to_ptr.vmem [resolvable:$true] %s185_s28 }
  0x35   : > { %s173_s30 = scalar_lea.sflag [#allocation6], %s761_s25  ;;  %s554_s4 = scalar_lea.hbm %s823_s20, 1024 }
  0x36   : > { %p555_p5 = scmp.ne.s32.totalorder %s823_s20, %s554_s4  ;;  %s559_s27 = scalar_lea.hbm %s976_s1, 2048 }
  0x37   : > { %p560_p1 = scmp.lt.u32.totalorder %s823_s20, %s976_s1  ;;  %p561_p3 = scmp.lt.u32.totalorder %s559_s27, %s554_s4 }
  0x38   : > { %p557_p10 = pnand %p555_p5, %p526_p2  ;;  %p563_p6 = scmp.lt.u32.totalorder %s554_s4, %s823_s20 }
  0x39   : > { %p562_p4 = por %p561_p3, %p560_p1 }
  0x3a   : > { %p558_p13 = pneg %p557_p10 }
  0x3b   : > { %p564_p7 = por %p563_p6, %p562_p4 }
  0x3d   : > { %p565_p9 = pnand %p564_p7, %p558_p13 }
  0x3f   : > { %568 = shalt.err (!%p565_p9)
}
  0x40   : > { %s569_s15 = scalar_lea.vmem %s825_s28, 1024  ;;  %s676_s26 = smov [#allocation5]  }
  0x41   : > { %p570_p11 = scmp.ne.s32.totalorder %s825_s28, %s569_s15  ;;  %s574_s6 = sshll.u32 %s676_s26, 4  ;;  %s575_s6 = int_to_ptr.vmem [resolvable:$false] %s574_s6 }
  0x42   : > { %s576_s29 = scalar_lea.vmem %s575_s6, 2048  ;;  %p577_p8 = scmp.lt.s32.totalorder %s825_s28, %s575_s6 }
  0x43   : > { %p572_p5 = pnand %p570_p11, %p526_p2  ;;  %p578_p1 = scmp.lt.s32.totalorder %s576_s29, %s569_s15 }
  0x45   : > { %p573_p10 = pneg %p572_p5  ;;  %p579_p3 = por %p578_p1, %p577_p8 }
  0x47   : > { %p580_p4 = pnand %p579_p3, %p573_p10 }
  0x49   : > { %583 = shalt.err (!%p580_p4)
}
  0x4a   : > { %463 = dma.hbm_to_vmem [thread:$0]  (!%p776_p0), %s823_s20, 1024, %s825_s28, %s173_s30, %s673_s3, %s674_s7, %s675_s8  }
  0x4b   : > { %197 = sbr.rel (%p814_p12) target bundleno = 115 (0x73), region = 28  ;;  %s859_s4 = sand.u32 (!%p814_p12), 1, %s654_s10  }
  0x4c   : > { %s444_s27 = sshll.u32 (!%p814_p12), %s859_s4, 7  ;;  %s200_s18 = scalar_lea.sflag (!%p814_p12), [#allocation3], %s859_s4 }
  0x4d   : > { %s863_s5 = scalar_lea.vmem (!%p814_p12), [#allocation2], %s444_s27  ;;  %p986_p8 = scmp.ne.s32.totalorder (!%p814_p12), %s981_s21, 0 }
  0x52   : > { %637 = dma.done.wait (%p986_p8), %s200_s18, 2048  }
  0x53   : > { %639 = vsyncadd (%p986_p8), %s200_s18, 4294965248  ;;  %s445_s25 = sshll.u32 %s859_s4, 6  ;;  %s209_s3 = scalar_lea.sflag [#allocation6], %s859_s4 }
  0x54   : > { %s871_s7 = scalar_lea.vmem [#allocation5], %s445_s25 }
  0x55   : > { %641 = dma.done.wait (%p986_p8), %s209_s3, 1024  }
  0x56   : > { %643 = vsyncadd (%p986_p8), %s209_s3, 4294966272  ;;  %v243_v0 = vld [vmem:[%s863_s5] sm:$0xff]  ;;  %v244_v2 = vld [vmem:[%s863_s5 + $0x8] sm:$0xff]  ;;  %s886_s21 = scalar_lea.vmem [#allocation7], %s444_s27  ;;  %s448_s8 = sshll.u32 %s662_s12, 7 }
  0x57   : > { %v259_v1 = vld [vmem:[%s871_s7] sm:$0xff]  ;;  %v260_v4 = vld [vmem:[%s871_s7 + $0x8] sm:$0xff]  ;;  %v245_v5 = vld [vmem:[%s863_s5 + $0x10] sm:$0xff]  ;;  %s318_s16 = sshll.u32 %s886_s21, 4  ;;  %s911_s28 = scalar_lea.hbm %s977_s2, %s448_s8  ;;  %s917_s16 = int_to_ptr.vmem [resolvable:$true] %s318_s16 }
  0x58   : > { %v267_v3 = vadd.f32 %v259_v1, %v243_v0  ;;  %v261_v6 = vld [vmem:[%s871_s7 + $0x10] sm:$0xff]  ;;  %v268_v7 = vadd.f32 %v260_v4, %v244_v2  ;;  %v246_v9 = vld [vmem:[%s863_s5 + $0x18] sm:$0xff]  ;;  %v247_v11 = vld [vmem:[%s863_s5 + $0x20] sm:$0xff]  ;;  %s300_s30 = scalar_lea.sflag [#allocation4], %s859_s4  ;;  %s584_s19 = scalar_lea.vmem %s917_s16, 2048 }
  0x59   : > { %v269_v8 = vadd.f32 %v261_v6, %v245_v5  ;;  %v262_v10 = vld [vmem:[%s871_s7 + $0x18] sm:$0xff]  ;;  %v263_v13 = vld [vmem:[%s871_s7 + $0x20] sm:$0xff]  ;;  %v248_v14 = vld [vmem:[%s863_s5 + $0x28] sm:$0xff]  ;;  %p585_p0 = scmp.ne.s32.totalorder %s917_s16, %s584_s19  ;;  %p987_p2 = scmp.ne.s32.totalorder %s982_s22, 0 }
  0x5a   : > { %283 = vst [vmem:[%s886_s21] sm:$0xff] %v267_v3  ;;  %v270_v12 = vadd.f32 %v262_v10, %v246_v9  ;;  %v264_v15 = vld [vmem:[%s871_s7 + $0x28] sm:$0xff]  ;;  %284 = vst [vmem:[%s886_s21 + $0x8] sm:$0xff] %v268_v7  ;;  %v271_v16 = vadd.f32 %v263_v13, %v247_v11  ;;  %v249_v18 = vld [vmem:[%s863_s5 + $0x30] sm:$0xff]  ;;  %s677_s15 = smov [#allocation7]  }
  0x5b   : > { %285 = vst [vmem:[%s886_s21 + $0x10] sm:$0xff] %v269_v8  ;;  %v272_v17 = vadd.f32 %v264_v15, %v248_v14  ;;  %v265_v19 = vld [vmem:[%s871_s7 + $0x30] sm:$0xff]  ;;  %v250_v20 = vld [vmem:[%s863_s5 + $0x38] sm:$0xff]  ;;  %v251_v23 = vld [vmem:[%s863_s5 + $0x40] sm:$0xff]  ;;  %p586_p12 = pnand %p585_p0, %p987_p2  ;;  %s588_s26 = sshll.u32 %s677_s15, 4  ;;  %s589_s26 = int_to_ptr.vmem [resolvable:$false] %s588_s26 }
  0x5c   : > { %286 = vst [vmem:[%s886_s21 + $0x18] sm:$0xff] %v270_v12  ;;  %v273_v21 = vadd.f32 %v265_v19, %v249_v18  ;;  %v266_v22 = vld [vmem:[%s871_s7 + $0x38] sm:$0xff]  ;;  %v252_v24 = vld [vmem:[%s863_s5 + $0x48] sm:$0xff]  ;;  %287 = vst [vmem:[%s886_s21 + $0x20] sm:$0xff] %v271_v16  ;;  %v275_v26 = vadd.f32 %v259_v1, %v251_v23  ;;  %s590_s6 = scalar_lea.vmem %s589_s26, 4096  ;;  %p591_p6 = scmp.lt.s32.totalorder %s917_s16, %s589_s26 }
  0x5d   : > { %288 = vst [vmem:[%s886_s21 + $0x28] sm:$0xff] %v272_v17  ;;  %v274_v25 = vadd.f32 %v266_v22, %v250_v20  ;;  %v276_v27 = vadd.f32 %v260_v4, %v252_v24  ;;  %v253_v28 = vld [vmem:[%s863_s5 + $0x50] sm:$0xff]  ;;  %v254_v29 = vld [vmem:[%s863_s5 + $0x58] sm:$0xff]  ;;  %v255_v30 = vld [vmem:[%s863_s5 + $0x60] sm:$0xff]  ;;  %p587_p13 = pneg %p586_p12  ;;  %p592_p7 = scmp.lt.s32.totalorder %s590_s6, %s584_s19 }
  0x5e   : > { %289 = vst [vmem:[%s886_s21 + $0x30] sm:$0xff] %v273_v21  ;;  %v277_v31 = vadd.f32 %v261_v6, %v253_v28  ;;  %v278_v32 = vadd.f32 %v262_v10, %v254_v29  ;;  %v279_v33 = vadd.f32 %v263_v13, %v255_v30  ;;  %v256_v34 = vld [vmem:[%s863_s5 + $0x68] sm:$0xff]  ;;  %v257_v35 = vld [vmem:[%s863_s5 + $0x70] sm:$0xff]  ;;  %v258_v36 = vld [vmem:[%s863_s5 + $0x78] sm:$0xff] }
  0x5f   : > { %290 = vst [vmem:[%s886_s21 + $0x38] sm:$0xff] %v274_v25  ;;  %291 = vst [vmem:[%s886_s21 + $0x40] sm:$0xff] %v275_v26  ;;  %v280_v37 = vadd.f32 %v264_v15, %v256_v34  ;;  %v281_v38 = vadd.f32 %v265_v19, %v257_v35  ;;  %v282_v39 = vadd.f32 %v266_v22, %v258_v36  ;;  %p593_p9 = por %p592_p7, %p591_p6 }
  0x60   : > { %292 = vst [vmem:[%s886_s21 + $0x48] sm:$0xff] %v276_v27  ;;  %293 = vst [vmem:[%s886_s21 + $0x50] sm:$0xff] %v277_v31 }
  0x61   : > { %294 = vst [vmem:[%s886_s21 + $0x58] sm:$0xff] %v278_v32  ;;  %295 = vst [vmem:[%s886_s21 + $0x60] sm:$0xff] %v279_v33  ;;  %p594_p11 = pnand %p593_p9, %p587_p13 }
  0x62   : > { %296 = vst [vmem:[%s886_s21 + $0x68] sm:$0xff] %v280_v37  ;;  %297 = vst [vmem:[%s886_s21 + $0x70] sm:$0xff] %v281_v38 }
  0x63   : > { %298 = vst [vmem:[%s886_s21 + $0x78] sm:$0xff] %v282_v39 }
  0x64   : > { %597 = shalt.err (!%p594_p11)
}
  0x65   : > { %s598_s29 = scalar_lea.hbm %s911_s28, 2048  ;;  %s602_s5 = scalar_lea.hbm %s977_s2, 4096 }
  0x66   : > { %p599_p5 = scmp.ne.s32.totalorder %s911_s28, %s598_s29  ;;  %p603_p3 = scmp.lt.u32.totalorder %s911_s28, %s977_s2 }
  0x67   : > { %p604_p4 = scmp.lt.u32.totalorder %s602_s5, %s598_s29  ;;  %p606_p0 = scmp.lt.u32.totalorder %s598_s29, %s911_s28 }
  0x68   : > { %p600_p10 = pnand %p599_p5, %p987_p2 }
  0x69   : > { %p605_p8 = por %p604_p4, %p603_p3 }
  0x6a   : > { %p601_p1 = pneg %p600_p10 }
  0x6b   : > { %p607_p12 = por %p606_p0, %p605_p8 }
  0x6d   : > { %p608_p13 = pnand %p607_p12, %p601_p1 }
  0x6f   : > { %611 = shalt.err (!%p608_p13)
}
  0x70   : > { %s678_s7 = smov 128   ;;  %s679_s21 = smov 256  }
  0x71   : > { %s680_s8 = smov 8  }
  0x72   : > { %455 = dma.vmem_to_hbm [thread:$0]  (%p987_p2), %s917_s16, 2048, %s911_s28, %s300_s30, %s678_s7, %s679_s21, %s680_s8  }
  0x73 PF: > { %s333_s12 = sand.u32 1, %s650_s9   ;;  %p988_p6 = scmp.ne.s32.totalorder %s983_s24, 0 }
  0x74   : > { %p989_p7 = scmp.ge.s32.totalorder %s670_s14, 2  ;;  %s334_s20 = scalar_lea.sflag [#allocation4], %s333_s12 }
  0x76   : > { %p465_p9 = pnand %p989_p7, %p988_p6 }
  0x78   : > { %645 = dma.done.wait (!%p465_p9), %s334_s20, 2048  }
  0x79   : > { %647 = vsyncadd (!%p465_p9), %s334_s20, 4294965248  ;;  %s21_s14 = sadd.s32 1, %s670_s14   ;;  %s990_s9 = smov %s654_s10 }
  0x7a   : > { %p18_p11 = scmp.ge.s32.totalorder %s21_s14, 4   ;;  %s991_s10 = smov %s658_s11 }
  0x7b   : > { %s992_s11 = smov %s752_s23  ;;  %s993_s12 = smov %s666_s13 }
  0x7c   : > { %s994_s13 = smov %s996_s17  ;;  %20 = sbr.rel (!%p18_p11) target bundleno = 8 (0x8), region = 86 }
  0x83   :  { %339 = vsyncpa [#allocation3], 1 }
  0x84   :  { %341 = vsyncpa [#allocation3 + $0x1], 1 }
  0x85   :  { %342 = vsyncpa [#allocation6], 1 }
  0x86   :  { %344 = vsyncpa [#allocation6 + $0x1], 1 }
  0x87   :  { %345 = vsyncpa [#allocation4], 1 }
  0x88   :  { %347 = vsyncpa [#allocation4 + $0x1], 1 }

</bundles_post_ra>
